<compile_context>
chip_gen: v6e
topology: v6e:2x2x1
jax: 0.10.0
libtpu: 0.0.40
codegen_flags: <defaults>
</compile_context>

<pallas_src>
import functools

import jax
import jax.numpy as jnp
from jax import lax
from jax.experimental import pallas as pl
from jax.experimental.pallas import tpu as pltpu


# ----------------------------- kernel helpers -------------------------------

def _silu(v):
    return v * jax.nn.sigmoid(v)


# --------------------------------- kernel -----------------------------------

def resnet_block_kernel(x_ref, cond_ref, wlin_ref, wfused_ref, w2_ref, theta_ref,
                        o_ref, *, in_channels, out_channels, dilation, batch_block):
    Cin, Cout = in_channels, out_channels
    T = x_ref.shape[-1]

    # Single consolidated parameter slab (one DMA): column params + the
    # per-channel group-averaging matrices for both GroupNorms.
    prm = theta_ref[...].astype(jnp.float32)                      # (Cmax, P)
    gn1_w, gn1_b = prm[:Cin, 0:1], prm[:Cin, 1:2]
    b1 = prm[:Cout, 2:3]
    gn2_w, gn2_b = prm[:Cout, 3:4], prm[:Cout, 4:5]
    b2 = prm[:Cout, 5:6]
    bout = prm[:Cout, 6:7]
    blin = prm[:2 * Cout, 7:8]
    a1 = prm[:Cin, 8:8 + Cin]                                     # (Cin, Cin)
    a2 = prm[:Cout, 8 + Cin:8 + Cin + Cout]                       # (Cout, Cout)

    wlin = wlin_ref[...].astype(jnp.float32)                      # (2*Cout, D)
    wfused = wfused_ref[...].astype(jnp.float32)                  # (2*Cout, 4*Cin)
    w2 = w2_ref[...].astype(jnp.float32)                          # (Cout, 3*Cout)

    # Hoisted time-index row, shared by every masked tap shift.
    t_row = lax.broadcasted_iota(jnp.int32, (1, T), 1)

    def masked_shift(v, off):
        # returns v[:, t + off] with zeros outside [0, T)
        if off == 0:
            return v
        shifted = pltpu.roll(v, (-off) % T, axis=1)
        valid = jnp.logical_and(t_row + off >= 0, t_row + off < T)
        return jnp.where(valid, shifted, 0.0)

    def group_norm(v, avg_mat, gamma, beta):
        # avg_mat[c, c'] = 1/(group_size*T) if same group else 0  -> one MXU push
        rs = jnp.concatenate([jnp.sum(v, axis=1, keepdims=True),
                              jnp.sum(v * v, axis=1, keepdims=True)], axis=1)
        cs = jnp.dot(avg_mat, rs, preferred_element_type=jnp.float32)  # (C, 2)
        mean = cs[:, 0:1]
        var = jnp.maximum(cs[:, 1:2] - mean * mean, 0.0)
        inv = lax.rsqrt(var + 1e-5)
        return (v - mean) * inv * gamma + beta

    for i in range(batch_block):                                  # static unroll
        x = x_ref[i].astype(jnp.float32)                          # (Cin, T)

        # Conditioning: SiLU -> Linear, in column form (no transpose needed).
        c = _silu(cond_ref[i].astype(jnp.float32))                # (D, 1)
        emb = jnp.dot(wlin, c, preferred_element_type=jnp.float32) + blin
        scale = emb[:Cout]                                        # (Cout, 1)
        shift = emb[Cout:]                                        # (Cout, 1)

        # block1: GN -> SiLU, then conv1 (k=3, dilated) fused with the residual
        # 1x1 conv as a single block-diagonal matmul over stacked taps.
        h = _silu(group_norm(x, a1, gn1_w, gn1_b))
        taps1 = jnp.concatenate(
            [masked_shift(h, -dilation), h, masked_shift(h, dilation), x], axis=0)
        y = jnp.dot(wfused, taps1, preferred_element_type=jnp.float32)  # (2*Cout,T)
        h = y[:Cout] + b1                                         # conv1 output
        res = y[Cout:] + bout                                     # residual path

        # block2: GN -> scale/shift -> SiLU -> conv2 (k=3, pad=1) as one matmul.
        h = group_norm(h, a2, gn2_w, gn2_b)
        h = h * (scale + 1.0) + shift
        # TODO(synk): optional inj_embeddings multiplicative gate not exercised (None path).
        h = _silu(h)
        taps2 = jnp.concatenate([masked_shift(h, -1), h, masked_shift(h, 1)], axis=0)
        h = jnp.dot(w2, taps2, preferred_element_type=jnp.float32) + b2

        o_ref[i] = (h + res).astype(o_ref.dtype)


# -------------------------------- wrapper ------------------------------------

def resnet_block_1d(x, cond, p, *, num_groups, dilation, batch_block=None):
    B, Cin, T = x.shape
    Cout = p["conv1_b"].shape[0]
    D = cond.shape[1]
    G = num_groups
    assert dilation < T, "roll+mask conv scheme requires dilation < T"
    assert Cin % G == 0 and Cout % G == 0

    # Two "parallel" grid steps when possible (keeps both v7x TensorCores busy);
    # each step processes B // 2 samples, so single-TC v5e/v6e only pay two
    # grid steps of pipeline overhead.
    if batch_block is None:
        batch_block = B // 2 if (B >= 2 and B % 2 == 0) else B
    assert B % batch_block == 0
    nb = B // batch_block

    f32 = jnp.float32

    # ---- one-time parameter packing (layout glue, outside the kernel) ----
    # conv1 (k=3, dilated) + residual 1x1 conv -> one block-diagonal weight.
    w1_flat = jnp.transpose(p["conv1_w"], (0, 2, 1)).reshape(Cout, 3 * Cin)
    wout = p["out_w"][:, :, 0]
    wfused = jnp.concatenate(
        [jnp.concatenate([w1_flat, jnp.zeros((Cout, Cin), f32)], axis=1),
         jnp.concatenate([jnp.zeros((Cout, 3 * Cin), f32), wout], axis=1)],
        axis=0)                                           # (2*Cout, 4*Cin)
    w2_flat = jnp.transpose(p["conv2_w"], (0, 2, 1)).reshape(Cout, 3 * Cout)
    wlin = p["lin_w"].astype(f32)                         # (2*Cout, D) PyTorch layout

    def group_avg(C):
        g = jnp.arange(C) // (C // G)
        m = (g[:, None] == g[None, :]).astype(f32)
        return m / float((C // G) * T)

    # Consolidated slab: 8 column params + both group-averaging matrices.
    Cmax = max(2 * Cout, Cin)
    P = 8 + Cin + Cout
    theta = jnp.zeros((Cmax, P), f32)
    theta = theta.at[:Cin, 0].set(p["gn1_w"])
    theta = theta.at[:Cin, 1].set(p["gn1_b"])
    theta = theta.at[:Cout, 2].set(p["conv1_b"])
    theta = theta.at[:Cout, 3].set(p["gn2_w"])
    theta = theta.at[:Cout, 4].set(p["gn2_b"])
    theta = theta.at[:Cout, 5].set(p["conv2_b"])
    theta = theta.at[:Cout, 6].set(p["out_b"])
    theta = theta.at[:2 * Cout, 7].set(p["lin_b"])
    theta = theta.at[:Cin, 8:8 + Cin].set(group_avg(Cin))
    theta = theta.at[:Cout, 8 + Cin:8 + Cin + Cout].set(group_avg(Cout))

    cond3 = cond[:, :, None].astype(f32)                  # (B, D, 1) column form

    kernel = functools.partial(
        resnet_block_kernel, in_channels=Cin, out_channels=Cout,
        dilation=dilation, batch_block=batch_block)

    def full(a):
        nd = a.ndim
        return pl.BlockSpec(a.shape, lambda b, nd=nd: (0,) * nd)

    return pl.pallas_call(
        kernel,
        out_shape=jax.ShapeDtypeStruct((B, Cout, T), x.dtype),
        grid=(nb,),
        in_specs=[
            pl.BlockSpec((batch_block, Cin, T), lambda b: (b, 0, 0)),   # x
            pl.BlockSpec((batch_block, D, 1), lambda b: (b, 0, 0)),     # cond column
            full(wlin), full(wfused), full(w2_flat), full(theta),
        ],
        out_specs=pl.BlockSpec((batch_block, Cout, T), lambda b: (b, 0, 0)),
        compiler_params=pltpu.CompilerParams(dimension_semantics=("parallel",)),
    )(x, cond3, wlin, wfused, w2_flat, theta)


# --------------------------- pure-JAX reference -------------------------------

def ref_forward(x, time_embed, class_embed, p, *, num_groups, dilation):
    def gn(v, w, b):
        B, C, T = v.shape
        vg = v.reshape(B, num_groups, (C // num_groups) * T)
        mean = vg.mean(-1, keepdims=True)
        var = ((vg - mean) ** 2).mean(-1, keepdims=True)
        vn = ((vg - mean) / jnp.sqrt(var + 1e-5)).reshape(B, C, T)
        return vn * w[None, :, None] + b[None, :, None]

    def silu(v):
        return v * jax.nn.sigmoid(v)

    def conv(v, w, b, dil, pad):
        y = jax.lax.conv_general_dilated(
            v, w, window_strides=(1,), padding=[(pad, pad)], rhs_dilation=(dil,),
            dimension_numbers=("NCH", "OIH", "NCH"),
            precision=jax.lax.Precision.HIGHEST)
        return y + b[None, :, None]

    cond = jnp.concatenate([time_embed, class_embed], axis=-1)
    emb = jnp.dot(silu(cond), p["lin_w"].T,
                  precision=jax.lax.Precision.HIGHEST) + p["lin_b"]
    Cout = p["conv1_w"].shape[0]
    scale = emb[:, :Cout][:, :, None]
    shift = emb[:, Cout:][:, :, None]

    h = conv(silu(gn(x, p["gn1_w"], p["gn1_b"])), p["conv1_w"], p["conv1_b"],
             dilation, dilation)
    h2 = gn(h, p["gn2_w"], p["gn2_b"])
    h2 = h2 * (scale + 1.0) + shift
    h2 = conv(silu(h2), p["conv2_w"], p["conv2_b"], 1, 1)
    res = conv(x, p["out_w"], p["out_b"], 1, 0)
    return h2 + res


# ----------------------------------- main -------------------------------------

if __name__ == "__main__":
    B, Cin, Cout, T = 2, 8, 16, 128
    G, dilation = 4, 2
    time_dim, class_dim = 16, 16
    D = time_dim + class_dim

    key = jax.random.PRNGKey(0)
    ks = jax.random.split(key, 16)

    def nrm(k, shape, s=0.1):
        return jax.random.normal(k, shape, jnp.float32) * s

    x = nrm(ks[0], (B, Cin, T), 1.0)
    time_embed = nrm(ks[1], (B, time_dim), 1.0)
    class_embed = nrm(ks[2], (B, class_dim), 1.0)

    # PyTorch-layout parameters (deterministic synthetic init).
    p = {
        "lin_w": nrm(ks[3], (2 * Cout, D)),
        "lin_b": nrm(ks[4], (2 * Cout,)),
        "gn1_w": 1.0 + nrm(ks[5], (Cin,)),
        "gn1_b": nrm(ks[6], (Cin,)),
        "conv1_w": nrm(ks[7], (Cout, Cin, 3)),
        "conv1_b": nrm(ks[8], (Cout,)),
        "gn2_w": 1.0 + nrm(ks[9], (Cout,)),
        "gn2_b": nrm(ks[10], (Cout,)),
        "conv2_w": nrm(ks[11], (Cout, Cout, 3)),
        "conv2_b": nrm(ks[12], (Cout,)),
        "out_w": nrm(ks[13], (Cout, Cin, 1)),
        "out_b": nrm(ks[14], (Cout,)),
    }

    cond = jnp.concatenate([time_embed, class_embed], axis=-1)

    out = resnet_block_1d(x, cond, p, num_groups=G, dilation=dilation)
    out = jax.block_until_ready(out)

    ref = ref_forward(x, time_embed, class_embed, p, num_groups=G, dilation=dilation)
    max_err = float(jnp.max(jnp.abs(out - ref)))
    assert jnp.allclose(out, ref, atol=2e-3, rtol=2e-3), f"max_abs_err={max_err}"

    print("KERNEL_OK")
</pallas_src>

<mosaic_0001>
module attributes {stable_mosaic.version = 11 : i64} {
  func.func @resnet_block_kernel(%arg0: i32, %arg1: memref<1x8x128xf32, #tpu.memory_space<vmem>>, %arg2: memref<1x32x1xf32, #tpu.memory_space<vmem>>, %arg3: memref<32x32xf32, #tpu.memory_space<vmem>>, %arg4: memref<32x32xf32, #tpu.memory_space<vmem>>, %arg5: memref<16x48xf32, #tpu.memory_space<vmem>>, %arg6: memref<32x32xf32, #tpu.memory_space<vmem>>, %arg7: memref<1x16x128xf32, #tpu.memory_space<vmem>>) attributes {dimension_semantics = [#tpu.dimension_semantics<parallel>], iteration_bounds = array<i64: 2>, scalar_prefetch = 0 : i64, scratch_operands = 0 : i64, tpu.core_type = #tpu.core_type<tc>, window_params = [{transform_indices = @transform_0, window_bounds = array<i64: 1, 8, 128>}, {transform_indices = @transform_1, window_bounds = array<i64: 1, 32, 1>}, {pipeline_mode = #tpu.pipeline_mode<synchronous>, transform_indices = @transform_2, window_bounds = array<i64: 32, 32>}, {pipeline_mode = #tpu.pipeline_mode<synchronous>, transform_indices = @transform_3, window_bounds = array<i64: 32, 32>}, {pipeline_mode = #tpu.pipeline_mode<synchronous>, transform_indices = @transform_4, window_bounds = array<i64: 16, 48>}, {pipeline_mode = #tpu.pipeline_mode<synchronous>, transform_indices = @transform_5, window_bounds = array<i64: 32, 32>}, {transform_indices = @transform_6, window_bounds = array<i64: 1, 16, 128>}]} {
    %c0 = arith.constant 0 : index
    %c0_0 = arith.constant 0 : index
    %0 = vector.load %arg6[%c0, %c0_0] : memref<32x32xf32, #tpu.memory_space<vmem>>, vector<32x32xf32>
    %1 = vector.extract_strided_slice %0 {offsets = [0, 0], sizes = [8, 1], strides = [1, 1]} : vector<32x32xf32> to vector<8x1xf32>
    %2 = vector.extract_strided_slice %0 {offsets = [0, 1], sizes = [8, 1], strides = [1, 1]} : vector<32x32xf32> to vector<8x1xf32>
    %3 = vector.extract_strided_slice %0 {offsets = [0, 2], sizes = [16, 1], strides = [1, 1]} : vector<32x32xf32> to vector<16x1xf32>
    %4 = vector.extract_strided_slice %0 {offsets = [0, 3], sizes = [16, 1], strides = [1, 1]} : vector<32x32xf32> to vector<16x1xf32>
    %5 = vector.extract_strided_slice %0 {offsets = [0, 4], sizes = [16, 1], strides = [1, 1]} : vector<32x32xf32> to vector<16x1xf32>
    %6 = vector.extract_strided_slice %0 {offsets = [0, 5], sizes = [16, 1], strides = [1, 1]} : vector<32x32xf32> to vector<16x1xf32>
    %7 = vector.extract_strided_slice %0 {offsets = [0, 6], sizes = [16, 1], strides = [1, 1]} : vector<32x32xf32> to vector<16x1xf32>
    %8 = vector.extract_strided_slice %0 {offsets = [0, 7], sizes = [32, 1], strides = [1, 1]} : vector<32x32xf32> to vector<32x1xf32>
    %9 = vector.extract_strided_slice %0 {offsets = [0, 8], sizes = [8, 8], strides = [1, 1]} : vector<32x32xf32> to vector<8x8xf32>
    %10 = vector.extract_strided_slice %0 {offsets = [0, 16], sizes = [16, 16], strides = [1, 1]} : vector<32x32xf32> to vector<16x16xf32>
    %c0_1 = arith.constant 0 : index
    %c0_2 = arith.constant 0 : index
    %11 = vector.load %arg3[%c0_1, %c0_2] : memref<32x32xf32, #tpu.memory_space<vmem>>, vector<32x32xf32>
    %c0_3 = arith.constant 0 : index
    %c0_4 = arith.constant 0 : index
    %12 = vector.load %arg4[%c0_3, %c0_4] : memref<32x32xf32, #tpu.memory_space<vmem>>, vector<32x32xf32>
    %c0_5 = arith.constant 0 : index
    %c0_6 = arith.constant 0 : index
    %13 = vector.load %arg5[%c0_5, %c0_6] : memref<16x48xf32, #tpu.memory_space<vmem>>, vector<16x48xf32>
    %14 = tpu.iota {dimensions = array<i32: 1>} : vector<1x128xi32>
    %c0_7 = arith.constant 0 : index
    %c0_8 = arith.constant 0 : index
    %c0_9 = arith.constant 0 : index
    %15 = vector.load %arg1[%c0_7, %c0_8, %c0_9] : memref<1x8x128xf32, #tpu.memory_space<vmem>>, vector<1x8x128xf32>
    %16 = vector.shape_cast %15 : vector<1x8x128xf32> to vector<8x128xf32>
    %c0_10 = arith.constant 0 : index
    %c0_11 = arith.constant 0 : index
    %c0_12 = arith.constant 0 : index
    %17 = vector.load %arg2[%c0_10, %c0_11, %c0_12] : memref<1x32x1xf32, #tpu.memory_space<vmem>>, vector<1x32x1xf32>
    %18 = vector.shape_cast %17 : vector<1x32x1xf32> to vector<32x1xf32>
    %19 = arith.negf %18 : vector<32x1xf32>
    %20 = math.exp %19 : vector<32x1xf32>
    %cst = arith.constant 1.000000e+00 : f32
    %21 = vector.broadcast %cst : f32 to vector<32x1xf32>
    %22 = arith.addf %21, %20 : vector<32x1xf32>
    %23 = arith.divf %21, %22 : vector<32x1xf32>
    %24 = arith.mulf %18, %23 : vector<32x1xf32>
    %cst_13 = arith.constant dense<0.000000e+00> : vector<32x1xf32>
    %25 = tpu.matmul %11, %24, %cst_13 {dimension_numbers = #tpu.dot_dimension_numbers<[1], [0], [0], [1], [0, 0, 1, 1], [], []>} : vector<32x32xf32>, vector<32x1xf32>, vector<32x1xf32> -> vector<32x1xf32>
    %26 = arith.addf %25, %8 : vector<32x1xf32>
    %27 = vector.extract_strided_slice %26 {offsets = [0, 0], sizes = [16, 1], strides = [1, 1]} : vector<32x1xf32> to vector<16x1xf32>
    %28 = vector.extract_strided_slice %26 {offsets = [16, 0], sizes = [16, 1], strides = [1, 1]} : vector<32x1xf32> to vector<16x1xf32>
    %cst_14 = arith.constant dense<0.000000e+00> : vector<8xf32>
    %29 = vector.multi_reduction <add>, %16, %cst_14 [1] : vector<8x128xf32> to vector<8xf32>
    %30 = vector.shape_cast %29 : vector<8xf32> to vector<8x1xf32>
    %31 = arith.mulf %16, %16 : vector<8x128xf32>
    %cst_15 = arith.constant dense<0.000000e+00> : vector<8xf32>
    %32 = vector.multi_reduction <add>, %31, %cst_15 [1] : vector<8x128xf32> to vector<8xf32>
    %33 = vector.shape_cast %32 : vector<8xf32> to vector<8x1xf32>
    %34 = tpu.concatenate %30, %33 in 1 : vector<8x1xf32>, vector<8x1xf32> -> vector<8x2xf32>
    %cst_16 = arith.constant dense<0.000000e+00> : vector<8x2xf32>
    %35 = tpu.matmul %9, %34, %cst_16 {dimension_numbers = #tpu.dot_dimension_numbers<[1], [0], [0], [1], [0, 0, 1, 1], [], []>} : vector<8x8xf32>, vector<8x2xf32>, vector<8x2xf32> -> vector<8x2xf32>
    %36 = vector.extract_strided_slice %35 {offsets = [0, 0], sizes = [8, 1], strides = [1, 1]} : vector<8x2xf32> to vector<8x1xf32>
    %37 = vector.extract_strided_slice %35 {offsets = [0, 1], sizes = [8, 1], strides = [1, 1]} : vector<8x2xf32> to vector<8x1xf32>
    %38 = arith.mulf %36, %36 : vector<8x1xf32>
    %39 = arith.subf %37, %38 : vector<8x1xf32>
    %cst_17 = arith.constant 0.000000e+00 : f32
    %40 = vector.broadcast %cst_17 : f32 to vector<8x1xf32>
    %41 = arith.maximumf %39, %40 : vector<8x1xf32>
    %cst_18 = arith.constant 9.99999974E-6 : f32
    %42 = vector.broadcast %cst_18 : f32 to vector<8x1xf32>
    %43 = arith.addf %41, %42 : vector<8x1xf32>
    %44 = math.rsqrt %43 : vector<8x1xf32>
    %45 = vector.broadcast %36 : vector<8x1xf32> to vector<8x128xf32>
    %46 = arith.subf %16, %45 : vector<8x128xf32>
    %47 = vector.broadcast %44 : vector<8x1xf32> to vector<8x128xf32>
    %48 = arith.mulf %46, %47 : vector<8x128xf32>
    %49 = vector.broadcast %1 : vector<8x1xf32> to vector<8x128xf32>
    %50 = arith.mulf %48, %49 : vector<8x128xf32>
    %51 = vector.broadcast %2 : vector<8x1xf32> to vector<8x128xf32>
    %52 = arith.addf %50, %51 : vector<8x128xf32>
    %53 = arith.negf %52 : vector<8x128xf32>
    %54 = math.exp %53 : vector<8x128xf32>
    %cst_19 = arith.constant 1.000000e+00 : f32
    %55 = vector.broadcast %cst_19 : f32 to vector<8x128xf32>
    %56 = arith.addf %55, %54 : vector<8x128xf32>
    %57 = arith.divf %55, %56 : vector<8x128xf32>
    %58 = arith.mulf %52, %57 : vector<8x128xf32>
    %c2_i32 = arith.constant 2 : i32
    %59 = tpu.dynamic_rotate %58 by %c2_i32 dim 1 : vector<8x128xf32>, i32 -> vector<8x128xf32>
    %c-2_i32 = arith.constant -2 : i32
    %60 = vector.broadcast %c-2_i32 : i32 to vector<1x128xi32>
    %61 = arith.addi %14, %60 : vector<1x128xi32>
    %c0_i32 = arith.constant 0 : i32
    %62 = vector.broadcast %c0_i32 : i32 to vector<1x128xi32>
    %63 = arith.cmpi sge, %61, %62 : vector<1x128xi32>
    %c-2_i32_20 = arith.constant -2 : i32
    %64 = vector.broadcast %c-2_i32_20 : i32 to vector<1x128xi32>
    %65 = arith.addi %14, %64 : vector<1x128xi32>
    %c128_i32 = arith.constant 128 : i32
    %66 = vector.broadcast %c128_i32 : i32 to vector<1x128xi32>
    %67 = arith.cmpi slt, %65, %66 : vector<1x128xi32>
    %68 = arith.andi %63, %67 : vector<1x128xi1>
    %cst_21 = arith.constant 0.000000e+00 : f32
    %69 = vector.shape_cast %68 : vector<1x128xi1> to vector<1x128xi1>
    %70 = vector.broadcast %69 : vector<1x128xi1> to vector<8x128xi1>
    %71 = vector.broadcast %cst_21 : f32 to vector<8x128xf32>
    %72 = arith.select %70, %59, %71 : vector<8x128xi1>, vector<8x128xf32>
    %c126_i32 = arith.constant 126 : i32
    %73 = tpu.dynamic_rotate %58 by %c126_i32 dim 1 : vector<8x128xf32>, i32 -> vector<8x128xf32>
    %c2_i32_22 = arith.constant 2 : i32
    %74 = vector.broadcast %c2_i32_22 : i32 to vector<1x128xi32>
    %75 = arith.addi %14, %74 : vector<1x128xi32>
    %c0_i32_23 = arith.constant 0 : i32
    %76 = vector.broadcast %c0_i32_23 : i32 to vector<1x128xi32>
    %77 = arith.cmpi sge, %75, %76 : vector<1x128xi32>
    %c2_i32_24 = arith.constant 2 : i32
    %78 = vector.broadcast %c2_i32_24 : i32 to vector<1x128xi32>
    %79 = arith.addi %14, %78 : vector<1x128xi32>
    %c128_i32_25 = arith.constant 128 : i32
    %80 = vector.broadcast %c128_i32_25 : i32 to vector<1x128xi32>
    %81 = arith.cmpi slt, %79, %80 : vector<1x128xi32>
    %82 = arith.andi %77, %81 : vector<1x128xi1>
    %cst_26 = arith.constant 0.000000e+00 : f32
    %83 = vector.shape_cast %82 : vector<1x128xi1> to vector<1x128xi1>
    %84 = vector.broadcast %83 : vector<1x128xi1> to vector<8x128xi1>
    %85 = vector.broadcast %cst_26 : f32 to vector<8x128xf32>
    %86 = arith.select %84, %73, %85 : vector<8x128xi1>, vector<8x128xf32>
    %87 = tpu.concatenate %72, %58, %86, %16 in 0 : vector<8x128xf32>, vector<8x128xf32>, vector<8x128xf32>, vector<8x128xf32> -> vector<32x128xf32>
    %cst_27 = arith.constant dense<0.000000e+00> : vector<32x128xf32>
    %88 = tpu.matmul %12, %87, %cst_27 {dimension_numbers = #tpu.dot_dimension_numbers<[1], [0], [0], [1], [0, 0, 1, 1], [], []>} : vector<32x32xf32>, vector<32x128xf32>, vector<32x128xf32> -> vector<32x128xf32>
    %89 = vector.extract_strided_slice %88 {offsets = [0, 0], sizes = [16, 128], strides = [1, 1]} : vector<32x128xf32> to vector<16x128xf32>
    %90 = vector.broadcast %3 : vector<16x1xf32> to vector<16x128xf32>
    %91 = arith.addf %89, %90 : vector<16x128xf32>
    %92 = vector.extract_strided_slice %88 {offsets = [16, 0], sizes = [16, 128], strides = [1, 1]} : vector<32x128xf32> to vector<16x128xf32>
    %93 = vector.broadcast %7 : vector<16x1xf32> to vector<16x128xf32>
    %94 = arith.addf %92, %93 : vector<16x128xf32>
    %cst_28 = arith.constant dense<0.000000e+00> : vector<16xf32>
    %95 = vector.multi_reduction <add>, %91, %cst_28 [1] : vector<16x128xf32> to vector<16xf32>
    %96 = vector.shape_cast %95 : vector<16xf32> to vector<16x1xf32>
    %97 = arith.mulf %91, %91 : vector<16x128xf32>
    %cst_29 = arith.constant dense<0.000000e+00> : vector<16xf32>
    %98 = vector.multi_reduction <add>, %97, %cst_29 [1] : vector<16x128xf32> to vector<16xf32>
    %99 = vector.shape_cast %98 : vector<16xf32> to vector<16x1xf32>
    %100 = tpu.concatenate %96, %99 in 1 : vector<16x1xf32>, vector<16x1xf32> -> vector<16x2xf32>
    %cst_30 = arith.constant dense<0.000000e+00> : vector<16x2xf32>
    %101 = tpu.matmul %10, %100, %cst_30 {dimension_numbers = #tpu.dot_dimension_numbers<[1], [0], [0], [1], [0, 0, 1, 1], [], []>} : vector<16x16xf32>, vector<16x2xf32>, vector<16x2xf32> -> vector<16x2xf32>
    %102 = vector.extract_strided_slice %101 {offsets = [0, 0], sizes = [16, 1], strides = [1, 1]} : vector<16x2xf32> to vector<16x1xf32>
    %103 = vector.extract_strided_slice %101 {offsets = [0, 1], sizes = [16, 1], strides = [1, 1]} : vector<16x2xf32> to vector<16x1xf32>
    %104 = arith.mulf %102, %102 : vector<16x1xf32>
    %105 = arith.subf %103, %104 : vector<16x1xf32>
    %cst_31 = arith.constant 0.000000e+00 : f32
    %106 = vector.broadcast %cst_31 : f32 to vector<16x1xf32>
    %107 = arith.maximumf %105, %106 : vector<16x1xf32>
    %cst_32 = arith.constant 9.99999974E-6 : f32
    %108 = vector.broadcast %cst_32 : f32 to vector<16x1xf32>
    %109 = arith.addf %107, %108 : vector<16x1xf32>
    %110 = math.rsqrt %109 : vector<16x1xf32>
    %111 = vector.broadcast %102 : vector<16x1xf32> to vector<16x128xf32>
    %112 = arith.subf %91, %111 : vector<16x128xf32>
    %113 = vector.broadcast %110 : vector<16x1xf32> to vector<16x128xf32>
    %114 = arith.mulf %112, %113 : vector<16x128xf32>
    %115 = vector.broadcast %4 : vector<16x1xf32> to vector<16x128xf32>
    %116 = arith.mulf %114, %115 : vector<16x128xf32>
    %117 = vector.broadcast %5 : vector<16x1xf32> to vector<16x128xf32>
    %118 = arith.addf %116, %117 : vector<16x128xf32>
    %cst_33 = arith.constant 1.000000e+00 : f32
    %119 = vector.broadcast %cst_33 : f32 to vector<16x1xf32>
    %120 = arith.addf %27, %119 : vector<16x1xf32>
    %121 = vector.broadcast %120 : vector<16x1xf32> to vector<16x128xf32>
    %122 = arith.mulf %118, %121 : vector<16x128xf32>
    %123 = vector.broadcast %28 : vector<16x1xf32> to vector<16x128xf32>
    %124 = arith.addf %122, %123 : vector<16x128xf32>
    %125 = arith.negf %124 : vector<16x128xf32>
    %126 = math.exp %125 : vector<16x128xf32>
    %cst_34 = arith.constant 1.000000e+00 : f32
    %127 = vector.broadcast %cst_34 : f32 to vector<16x128xf32>
    %128 = arith.addf %127, %126 : vector<16x128xf32>
    %129 = arith.divf %127, %128 : vector<16x128xf32>
    %130 = arith.mulf %124, %129 : vector<16x128xf32>
    %c1_i32 = arith.constant 1 : i32
    %131 = tpu.dynamic_rotate %130 by %c1_i32 dim 1 : vector<16x128xf32>, i32 -> vector<16x128xf32>
    %c-1_i32 = arith.constant -1 : i32
    %132 = vector.broadcast %c-1_i32 : i32 to vector<1x128xi32>
    %133 = arith.addi %14, %132 : vector<1x128xi32>
    %c0_i32_35 = arith.constant 0 : i32
    %134 = vector.broadcast %c0_i32_35 : i32 to vector<1x128xi32>
    %135 = arith.cmpi sge, %133, %134 : vector<1x128xi32>
    %c-1_i32_36 = arith.constant -1 : i32
    %136 = vector.broadcast %c-1_i32_36 : i32 to vector<1x128xi32>
    %137 = arith.addi %14, %136 : vector<1x128xi32>
    %c128_i32_37 = arith.constant 128 : i32
    %138 = vector.broadcast %c128_i32_37 : i32 to vector<1x128xi32>
    %139 = arith.cmpi slt, %137, %138 : vector<1x128xi32>
    %140 = arith.andi %135, %139 : vector<1x128xi1>
    %cst_38 = arith.constant 0.000000e+00 : f32
    %141 = vector.shape_cast %140 : vector<1x128xi1> to vector<1x128xi1>
    %142 = vector.broadcast %141 : vector<1x128xi1> to vector<16x128xi1>
    %143 = vector.broadcast %cst_38 : f32 to vector<16x128xf32>
    %144 = arith.select %142, %131, %143 : vector<16x128xi1>, vector<16x128xf32>
    %c127_i32 = arith.constant 127 : i32
    %145 = tpu.dynamic_rotate %130 by %c127_i32 dim 1 : vector<16x128xf32>, i32 -> vector<16x128xf32>
    %c1_i32_39 = arith.constant 1 : i32
    %146 = vector.broadcast %c1_i32_39 : i32 to vector<1x128xi32>
    %147 = arith.addi %14, %146 : vector<1x128xi32>
    %c0_i32_40 = arith.constant 0 : i32
    %148 = vector.broadcast %c0_i32_40 : i32 to vector<1x128xi32>
    %149 = arith.cmpi sge, %147, %148 : vector<1x128xi32>
    %c1_i32_41 = arith.constant 1 : i32
    %150 = vector.broadcast %c1_i32_41 : i32 to vector<1x128xi32>
    %151 = arith.addi %14, %150 : vector<1x128xi32>
    %c128_i32_42 = arith.constant 128 : i32
    %152 = vector.broadcast %c128_i32_42 : i32 to vector<1x128xi32>
    %153 = arith.cmpi slt, %151, %152 : vector<1x128xi32>
    %154 = arith.andi %149, %153 : vector<1x128xi1>
    %cst_43 = arith.constant 0.000000e+00 : f32
    %155 = vector.shape_cast %154 : vector<1x128xi1> to vector<1x128xi1>
    %156 = vector.broadcast %155 : vector<1x128xi1> to vector<16x128xi1>
    %157 = vector.broadcast %cst_43 : f32 to vector<16x128xf32>
    %158 = arith.select %156, %145, %157 : vector<16x128xi1>, vector<16x128xf32>
    %159 = tpu.concatenate %144, %130, %158 in 0 : vector<16x128xf32>, vector<16x128xf32>, vector<16x128xf32> -> vector<48x128xf32>
    %cst_44 = arith.constant dense<0.000000e+00> : vector<16x128xf32>
    %160 = tpu.matmul %13, %159, %cst_44 {dimension_numbers = #tpu.dot_dimension_numbers<[1], [0], [0], [1], [0, 0, 1, 1], [], []>} : vector<16x48xf32>, vector<48x128xf32>, vector<16x128xf32> -> vector<16x128xf32>
    %161 = vector.broadcast %6 : vector<16x1xf32> to vector<16x128xf32>
    %162 = arith.addf %160, %161 : vector<16x128xf32>
    %163 = arith.addf %162, %94 : vector<16x128xf32>
    %c0_45 = arith.constant 0 : index
    %c0_46 = arith.constant 0 : index
    %c0_47 = arith.constant 0 : index
    %164 = vector.load %arg7[%c0_45, %c0_46, %c0_47] : memref<1x16x128xf32, #tpu.memory_space<vmem>>, vector<1x16x128xf32>
    %165 = vector.shape_cast %164 : vector<1x16x128xf32> to vector<16x128xf32>
    %166 = vector.shape_cast %163 : vector<16x128xf32> to vector<1x16x128xf32>
    tpu.vector_store %arg7[%c0_45, %c0_46, %c0_47], %166 {strides = array<i32>} : memref<1x16x128xf32, #tpu.memory_space<vmem>>, vector<1x16x128xf32>,
    return
  }
  func.func @transform_0(%arg0: i32) -> (i32, i32, i32) {
    %c0_i32 = arith.constant 0 : i32
    %c0_i32_0 = arith.constant 0 : i32
    %c0_i32_1 = arith.constant 0 : i32
    return %arg0, %c0_i32, %c0_i32_0 : i32, i32, i32
  }
  func.func @transform_1(%arg0: i32) -> (i32, i32, i32) {
    %c0_i32 = arith.constant 0 : i32
    %c0_i32_0 = arith.constant 0 : i32
    %c0_i32_1 = arith.constant 0 : i32
    return %arg0, %c0_i32, %c0_i32_0 : i32, i32, i32
  }
  func.func @transform_2(%arg0: i32) -> (i32, i32) {
    %c0_i32 = arith.constant 0 : i32
    %c0_i32_0 = arith.constant 0 : i32
    %c0_i32_1 = arith.constant 0 : i32
    return %c0_i32, %c0_i32_0 : i32, i32
  }
  func.func @transform_3(%arg0: i32) -> (i32, i32) {
    %c0_i32 = arith.constant 0 : i32
    %c0_i32_0 = arith.constant 0 : i32
    %c0_i32_1 = arith.constant 0 : i32
    return %c0_i32, %c0_i32_0 : i32, i32
  }
  func.func @transform_4(%arg0: i32) -> (i32, i32) {
    %c0_i32 = arith.constant 0 : i32
    %c0_i32_0 = arith.constant 0 : i32
    %c0_i32_1 = arith.constant 0 : i32
    return %c0_i32, %c0_i32_0 : i32, i32
  }
  func.func @transform_5(%arg0: i32) -> (i32, i32) {
    %c0_i32 = arith.constant 0 : i32
    %c0_i32_0 = arith.constant 0 : i32
    %c0_i32_1 = arith.constant 0 : i32
    return %c0_i32, %c0_i32_0 : i32, i32
  }
  func.func @transform_6(%arg0: i32) -> (i32, i32, i32) {
    %c0_i32 = arith.constant 0 : i32
    %c0_i32_0 = arith.constant 0 : i32
    %c0_i32_1 = arith.constant 0 : i32
    return %arg0, %c0_i32, %c0_i32_0 : i32, i32, i32
  }
}

</mosaic_0001>

<bundles_post_ra>
// kernel: tpu_custom_call.1
= control target key start
LH: loop header
LB: loop body
LE: loop exit
PB: predicated region body
PF: predicated region fallthrough
CT: control target
= control target key end

     0   :  { %s1944_s0 = inlined_call_operand.hbm [shape: f32[2,8,128], index: 0, kind: input, shape index: {}]   ;;  %s1945_s1 = inlined_call_operand.vmem [shape: f32[2,32,1], index: 1, kind: input, shape index: {}]   ;;  %s1946_s2 = inlined_call_operand.vmem [shape: f32[32,32], index: 2, kind: input, shape index: {}]   ;;  %s1947_s3 = inlined_call_operand.vmem [shape: f32[32,32], index: 3, kind: input, shape index: {}]   ;;  %s1948_s4 = inlined_call_operand.hbm [shape: f32[16,48], index: 4, kind: input, shape index: {}]   ;;  %s1949_s5 = inlined_call_operand.hbm [shape: f32[32,32], index: 5, kind: input, shape index: {}]   ;;  %s1950_s6 = inlined_call_operand.hbm [shape: f32[2,16,128], index: 6, kind: output, shape index: {}]  }
   0x1   :  { %1955 = sst [smem:[#allocation12_spill]] %s1948_s4 }
   0x2   :  { %11 = vsyncpa [#allocation3], 0 }
   0x3   :  { %13 = vsyncpa [#allocation3 + $0x1], 0 }
   0x4   :  { %14 = vsyncpa [#allocation6], 0 }
   0x5   :  { %15 = vsyncpa [#allocation4], 0 }
   0x6   :  { %17 = vsyncpa [#allocation4 + $0x1], 0  ;;  %s1646_s21 = smov 0   ;;  %s1648_s22 = smov 0  }
   0x7   :  { %s1650_s23 = smov 0   ;;  %s1652_s24 = smov 0  }
   0x8 LB: > { %s1667_s25 = sadd.s32 4294967295, %s1585_s24   ;;  %s1168_s26 = sadd.s32 4294967294, %s1585_s24   ;;  %s1585_s24 = sphi %s1652_s24, %s1974_s24   ;;  %s1581_s23 = sphi %s1650_s23, %s1973_s23   ;;  %s1577_s22 = sphi %s1648_s22, %s1972_s22   ;;  %s1573_s21 = sphi %s1646_s21, %s1971_s21  }
   0x9   : > { %p43_p0 = scmp.ne.s32.totalorder %s1577_s22, %s1573_s21  ;;  %p1951_p1 = scmp.eq.s32.totalorder %s1667_s25, 0 }
   0xa   : > { %p183_p3 = scmp.eq.s32.totalorder %s1168_s26, 1  ;;  %p1169_p5 = scmp.ge.s32.totalorder %s1585_s24, 1 }
   0xb   : > { %p1676_p4 = por %p1951_p1, %p43_p0  ;;  %p190_p7 = scmp.lt.s32.totalorder %s1585_s24, 3 }
   0xc   : > { %p1681_p6 = por %p183_p3, %p43_p0  ;;  %s1587_s30 = smov [#allocation5]  }
   0xd   : > { %s1956_s27 = scalar_select %p1676_p4, 1, 0 }
   0xe   : > { %s1957_s28 = scalar_select %p1681_p6, 1, 0 }
   0xf   : > { %p1686_p8 = pnand %p1169_p5, %p190_p7  ;;  %s208_s7 = sshll.u32 %s1587_s30, 4  ;;  %s209_s7 = int_to_ptr.vmem [resolvable:$true] %s208_s7 }
  0x10   : > { %s1588_s9 = smov [#allocation7]   ;;  %s1448_s11 = scalar_lea.vmem %s209_s7, 256 }
  0x11   : > { %s1958_s29 = scalar_select %p1686_p8, 1, 0 }
  0x12   : > { %p1312_p9 = pneg %p1686_p8  ;;  %s221_s10 = sshll.u32 %s1588_s9, 4  ;;  %s222_s10 = int_to_ptr.vmem [resolvable:$true] %s221_s10 }
  0x13   : > { %p1449_p13 = scmp.ne.s32.totalorder %s209_s7, %s1448_s11  ;;  %p1456_p5 = scmp.lt.s32.totalorder %s209_s7, %s209_s7 }
  0x14   : > { %p1695_p11 = pnand %p1312_p9, %p1951_p1  ;;  %p1457_p7 = scmp.lt.s32.totalorder %s1448_s11, %s1448_s11 }
  0x16   : > { %p1439_p12 = pneg %p1695_p11  ;;  %p1458_p10 = por %p1457_p7, %p1456_p5 }
  0x18   : > { %p1451_p0 = pnand %p1449_p13, %p1439_p12 }
  0x1a   : > { %p1452_p3 = pneg %p1451_p0 }
  0x1c   : > { %p1459_p9 = pnand %p1458_p10, %p1452_p3 }
  0x1e   : > { %1462 = shalt.err (!%p1459_p9)
}
  0x1f   : > { %s1589_s12 = smov 128   ;;  %s1590_s13 = smov 8  }
  0x20   : > { %s1960_s4 = sld [smem:[#allocation12_spill]]  ;;  %s1474_s16 = scalar_lea.vmem %s222_s10, 512 }
  0x21   : > { %p1475_p1 = scmp.ne.s32.totalorder %s222_s10, %s1474_s16  ;;  %p1482_p2 = scmp.lt.s32.totalorder %s222_s10, %s222_s10 }
  0x22   : > { %p1483_p6 = scmp.lt.s32.totalorder %s1474_s16, %s1474_s16 }
  0x23   : > { %p1477_p13 = pnand %p1475_p1, %p1439_p12 }
  0x24   : > { %p1484_p5 = por %p1483_p6, %p1482_p2 }
  0x25   : > { %p1478_p0 = pneg %p1477_p13 }
  0x26   : > { %1315 = dma.hbm_to_vmem [thread:$0]  (!%p1695_p11), %s1960_s4, 256, %s209_s7, [#allocation6], %s1589_s12, %s1589_s12, %s1590_s13  }
  0x27   : > { %p1485_p10 = pnand %p1484_p5, %p1478_p0 }
  0x29   : > { %1488 = shalt.err (!%p1485_p10)
}
  0x2a   : > { %1318 = dma.hbm_to_vmem [thread:$0]  (!%p1695_p11), %s1949_s5, 512, %s222_s10, [#allocation6], %s1589_s12, %s1589_s12, %s1590_s13  }
  0x2b   : > { %s1718_s19 = sadd.s32 1, %s1585_s24   ;;  %s30_s20 = sadd.s32 1, %s1581_s23 }
  0x2c   : > { %s27_s26 = ssub.s32 %s1585_s24, %s1718_s19  ;;  %p37_p1 = scmp.ne.s32.totalorder %s1581_s23, %s1577_s22 }
  0x2d   : > { %p28_p2 = scmp.eq.s32.totalorder %s27_s26, 0  ;;  %p38_p6 = scmp.eq.s32.totalorder %s1585_s24, 0 }
  0x2e   : > { %p1961_p12 = scmp.eq.s32.totalorder %s1667_s25, 1  ;;  %p1329_p7 = scmp.lt.s32.totalorder %s1585_s24, 2 }
  0x2f   : > { %s1734_s7 = scalar_select %p28_p2, %s1581_s23, %s30_s20  }
  0x30   : > { %p1728_p3 = por %p1961_p12, %p37_p1  ;;  %p39_p9 = por %p38_p6, %p37_p1 }
  0x31   : > { %s235_s8 = sand.u32 1, %s1581_s23   ;;  %s1174_s10 = sshll.u32 %s1585_s24, 7 }
  0x32   : > { %s1962_s30 = scalar_select %p1728_p3, 1, 0 }
  0x33   : > { %s1173_s9 = sshll.u32 %s235_s8, 3  ;;  %s1741_s13 = scalar_lea.hbm %s1944_s0, %s1174_s10 }
  0x34   : > { %s239_s14 = scalar_lea.vmem [#allocation2], %s1173_s9  ;;  %p1743_p11 = pnand %p1329_p7, %p39_p9 }
  0x35   : > { %s246_s15 = sshll.u32 %s239_s14, 4  ;;  %s236_s17 = scalar_lea.sflag [#allocation3], %s235_s8  ;;  %s247_s15 = int_to_ptr.vmem [resolvable:$true] %s246_s15 }
  0x36   : > { %s1489_s18 = scalar_lea.hbm %s1741_s13, 128  ;;  %p1491_p0 = pneg %p1743_p11 }
  0x37   : > { %p1490_p13 = scmp.ne.s32.totalorder %s1741_s13, %s1489_s18  ;;  %s1494_s10 = scalar_lea.hbm %s1944_s0, 256 }
  0x38   : > { %p1495_p1 = scmp.lt.s32.totalorder %s1741_s13, %s1944_s0  ;;  %p1496_p2 = scmp.lt.s32.totalorder %s1494_s10, %s1489_s18 }
  0x39   : > { %p1492_p5 = pnand %p1491_p0, %p1490_p13 }
  0x3a   : > { %p1497_p6 = por %p1496_p2, %p1495_p1 }
  0x3b   : > { %p1493_p10 = pneg %p1492_p5 }
  0x3d   : > { %p1498_p12 = pnand %p1497_p6, %p1493_p10 }
  0x3f   : > { %1501 = shalt.err (!%p1498_p12)
}
  0x40   : > { %s1502_s12 = scalar_lea.vmem %s247_s15, 128  ;;  %s1591_s8 = smov [#allocation2]  }
  0x41   : > { %p1503_p7 = scmp.ne.s32.totalorder %s247_s15, %s1502_s12  ;;  %s1507_s14 = sshll.u32 %s1591_s8, 4  ;;  %s1508_s14 = int_to_ptr.vmem [resolvable:$false] %s1507_s14 }
  0x42   : > { %s1509_s4 = scalar_lea.vmem %s1508_s14, 256  ;;  %p1510_p13 = scmp.lt.s32.totalorder %s247_s15, %s1508_s14 }
  0x43   : > { %p1505_p9 = pnand %p1503_p7, %p1491_p0  ;;  %p1511_p5 = scmp.lt.s32.totalorder %s1509_s4, %s1502_s12 }
  0x45   : > { %p1506_p3 = pneg %p1505_p9  ;;  %p1512_p4 = por %p1511_p5, %p1510_p13 }
  0x47   : > { %p1513_p8 = pnand %p1512_p4, %p1506_p3 }
  0x49   : > { %1516 = shalt.err (!%p1513_p8)
}
  0x4a   : > { %1322 = dma.hbm_to_vmem [thread:$0]  (!%p1743_p11), %s1741_s13, 128, %s247_s15, %s236_s17  }
  0x4b   : > { %p1964_p10 = scmp.ne.s32.totalorder %s1958_s29, 0 }
  0x4c   : > { %s1764_s18 = sand.u32 (!%p1964_p10), 1, %s1577_s22   ;;  %p1965_p0 = scmp.ne.s32.totalorder (!%p1964_p10), %s1956_s27, 0 }
  0x4d   : > { %263 = sbr.rel (%p1964_p10) target bundleno = 2035 (0x7f3), region = 44  ;;  %s1176_s20 = sshll.u32 (!%p1964_p10), %s1764_s18, 3 }
  0x4e   : > { %s266_s26 = scalar_lea.sflag (!%p1964_p10), [#allocation3], %s1764_s18  ;;  %s269_s10 = scalar_lea.vmem (!%p1964_p10), [#allocation2], %s1176_s20 }
  0x52   : > { %1560 = dma.done.wait (%p1965_p0), %s266_s26, 128  }
  0x53   : > { %1562 = vsyncadd (%p1965_p0), %s266_s26, 4294967168  ;;  %p1966_p4 = scmp.eq.s32.totalorder %s1667_s25, 0 }
  0x55   : > { %1564 = dma.done.wait (%p1966_p4), [#allocation6], 768   ;;  %p1967_p8 = pmov %p1966_p4 }
  0x56   : > { %p311_p3 = scmp.lt.s32.totalorder %s1667_s25, 1  ;;  %v1781_v0 = vld [vmem:[%s269_s10] sm:$0xff]  ;;  %s1592_s27 = smov 120   ;;  %vm381_vm0 = vcmask 261120   ;;  %v322_v29 = vld [vmem:[%s1946_s2 + $0x10] sm:$0xff]  ;;  %v1593_v30 = vmov 0.0  }
  0x57   : > { %1566 = vsyncadd (%p1967_p8), [#allocation6], 4294966528  ;;  %v1783_v1 = vld [vmem:[#allocation7] sm:$0xff]  ;;  %479 = vadd.xlane.f32.xlu0 %v1781_v0  ;;  %v481_v3 = vmul.f32 %v1781_v0, %v1781_v0  ;;  %1264 = vmatprep.subr.mxu1 %v1781_v0  ;;  %v321_v28 = vld [vmem:[%s1946_s2 + $0x8] sm:$0xff]  ;;  %vm1594_vm1 = vmmov 0   ;;  %vm484_vm2 = vcmask 7168  }
  0x58   : > { %s312_s4 = scalar_select %p311_p3, %s1667_s25, 1  ;;  %486 = vrot.lane.b32.xlu1 %v1783_v1, %s1592_s27  ;;  %v320_v11 = vld [vmem:[%s1946_s2] sm:$0xff]  ;;  %1265 = vmatpush3.msra.mxu1 %v1781_v0  ;;  %v323_v31 = vld [vmem:[%s1946_s2 + $0x18] sm:$0xff]  ;;  %vm488_vm3 = vcmask 64512   ;;  %v1595_v36 = vmov 0   ;;  %v1597_v44 = vmov 1  }
  0x59   : > { %1253 = vmatprep.mubr.msk.f32.mxu0 %vm381_vm0, %v320_v11  ;;  %1387 = vset.pattern.permute.xlu0 %v1595_v36  ;;  %s1596_s10 = smov 1   ;;  %v324_v61 = vld [vmem:[%s1947_s3] sm:$0xff]  ;;  %v1598_v62 = vmov 2   ;;  %s1599_s13 = smov 126   ;;  %vm750_vm6 = vcmask 130048   ;;  %vm964_vm7 = vcmask 392192  }
  0x5a   : > { %s1213_s29 = sshll.u32 %s312_s4, 5  ;;  %1388 = vset.pattern.permute.xlu1 %v1595_v36  ;;  %1272 = vmatprep.mubr.msk.f32.mxu1 %vm381_vm0, %v324_v61  ;;  %s1600_s15 = smov 2  }
  0x5b   : > { %s315_s16 = scalar_lea.vmem %s1945_s1, %s1213_s29  ;;  %482 = vadd.xlane.f32.xlu0 %v481_v3  ;;  %v330_v3 = vlaneseq  ;;  %s1601_s17 = smov 112  }
  0x5c   : > { %v336_v2 = vld [vmem:[%s315_s16 + $0x18] sm:$0xff]  ;;  %v335_v5 = vld [vmem:[%s315_s16 + $0x10] sm:$0xff]  ;;  %v334_v6 = vld [vmem:[%s315_s16 + $0x8] sm:$0xff]  ;;  %s1602_s11 = smov 121   ;;  %s1605_s20 = smov 127  }
  0x5d   : > { %v1185_v4 = vmul.f32 -1.442695, %v336_v2  ;;  %v333_v7 = vld [vmem:[%s315_s16] sm:$0xff]  ;;  %v1184_v8 = vmul.f32 -1.442695, %v335_v5  ;;  %s1179_s26 = sshll.u32 %s1764_s18, 4 }
  0x5e   : > { %v1183_v9 = vmul.f32 -1.442695, %v334_v6  ;;  %v1182_v10 = vmul.f32 -1.442695, %v333_v7  ;;  %s1214_s29 = sshll.u32 %s1667_s25, 8  ;;  %s1051_s27 = scalar_lea.sflag [#allocation4], %s1764_s18 }
  0x5f   : > { %1403 = vpow2.f32 %v1185_v4  ;;  %v1832_v4 = vand.u32 127, %v330_v3  ;;  %s1901_s16 = scalar_lea.hbm %s1950_s6, %s1214_s29  ;;  %p1968_p1 = scmp.ne.s32.totalorder %s1962_s30, 0 }
  0x60   : > { %1405 = vpow2.f32 %v1184_v8  ;;  %s1608_s25 = smov [#allocation8]  }
  0x61   : > { %1407 = vpow2.f32 %v1183_v9  ;;  %v325_v9 = vld [vmem:[%s1947_s3 + $0x8] sm:$0xff] }
  0x62   : > { %1409 = vpow2.f32 %v1182_v10 }
  0x6c   : > { %v1404_v12 = vpop.eup %1403 }
  0x6d   : > { %v1406_v13 = vpop.eup %1405  ;;  %v352_v14 = vadd.f32 1.0, %v1404_v12 }
  0x6e   : > { %v1408_v15 = vpop.eup %1407  ;;  %v351_v16 = vadd.f32 1.0, %v1406_v13 }
  0x6f   : > { %v1410_v17 = vpop.eup %1409  ;;  %1411 = vrcp.f32 %v352_v14  ;;  %v350_v18 = vadd.f32 1.0, %v1408_v15 }
  0x70   : > { %1413 = vrcp.f32 %v351_v16  ;;  %v349_v19 = vadd.f32 1.0, %v1410_v17 }
  0x71   : > { %1415 = vrcp.f32 %v350_v18  ;;  %v319_v18 = vld [vmem:[#allocation7 + $0x18] sm:$0xff] }
  0x72   : > { %1417 = vrcp.f32 %v349_v19 }
  0x7c   : > { %v1412_v20 = vpop.eup %1411 }
  0x7d   : > { %v1414_v21 = vpop.eup %1413  ;;  %v364_v22 = vmul.f32 %v1412_v20, %v336_v2  ;;  %v1827_v2 = vld [vmem:[#allocation7 + $0x8] sm:$0xff] }
  0x7e   : > { %v1416_v23 = vpop.eup %1415  ;;  %v363_v24 = vmul.f32 %v1414_v21, %v335_v5  ;;  %v610_v5 = vadd.s32 2, %v1832_v4 }
  0x7f   : > { %v1418_v25 = vpop.eup %1417  ;;  %1245 = vmatprep.subr.mxu0 %v364_v22  ;;  %v362_v26 = vmul.f32 %v1416_v23, %v334_v6  ;;  %v601_v6 = vadd.s32 4294967294, %v1832_v4 }
  0x80   : > { %1246 = vmatpush3.msra.mxu0 %v364_v22  ;;  %v361_v27 = vmul.f32 %v1418_v25, %v333_v7  ;;  %vm612_vm4 = vcmp.lt.s32.totalorder %v610_v5, 128 }
  0x81   : > { %1247 = vmatprep.subr.mxu0 %v363_v24  ;;  %vm602_vm5 = vcmp.ge.s32.totalorder %v601_v6, 0 }
  0x82   : > { %1248 = vmatpush3.msra.mxu0 %v363_v24 }
  0x83   : > { %1249 = vmatprep.subr.mxu0 %v362_v26 }
  0x84   : > { %1250 = vmatpush3.msra.mxu0 %v362_v26 }
  0x85   : > { %1251 = vmatprep.subr.mxu0 %v361_v27 }
  0x86   : > { %1252 = vmatpush3.msra.mxu0 %v361_v27 }
  0x87   : > { %1254 = vmatmul.mubr.msk.f32.vlgmr.msra.gmra.mxu0 %vm381_vm0, %v321_v28  ;;  %1259 = vmatprep.subr.mxu0 %v1593_v30 }
  0x88   : > { %1256 = vmatprep.mubr.msk.f32.mxu0 %vm381_vm0, %v322_v29 }
  0x8b   : > { %1257 = vmatmul.mubr.msk.f32.gmra.mxu0 %vm381_vm0, %v323_v31  ;;  %v1603_v31 = vmov 3  }
  0x8c   : > { %1261 = vmatprep.mubr.msk.f32.mxu0 %vm1594_vm1, %v1593_v30 }
  0xca   : > { %v487_v34 = vpop.permute.xlu1 %486 }
  0xe0   : > { %v480_v32 = vpop.xlane.xlu0 %479 }
  0xe4   : > { %v483_v33 = vpop.xlane.xlu0 %482 }
  0xe5   : > { %v485_v35 = vsel %vm484_vm2, %v480_v32, %v483_v33  ;;  %v318_v32 = vld [vmem:[#allocation7 + $0x10] sm:$0xff]  ;;  %v1604_v33 = vmov 4  }
  0xe6   : > { %1260 = vmatpush3.msra.mxu0 %v485_v35 }
  0xe7   : > { %1262 = vmatmul.mubr.msk.f32.vlgmr.msra.gmra.mxu0 %vm488_vm3, %v487_v34 }
 0x147   : > { %v1810_v37 = vpop.f32.mrf.mxu0 }
 0x149   : > { %v1812_v38 = vpop.f32.mrf.mxu0 }
 0x14b   : > { %v1814_v39 = vpop.f32.mrf.mxu0 }
 0x14d   : > { %v1816_v40 = vpop.f32.mrf.mxu0 }
 0x1a7   : > { %v557_v41 = vpop.f32.mrf.mxu0 }
 0x1a8   : > { %v561_v42 = vmul.f32 %v557_v41, %v557_v41  ;;  %572 = vperm.xlu0 %1387, %v557_v41  }
 0x1a9   : > { %v1263_v43 = vpop.f32.mrf.mxu0 }
 0x1aa   : > { %563 = vrot.lane.b32.xlu1 %v561_v42, %s1596_s10 }
 0x1ae   : > { %583 = vperm.xlu1 %1388, %v1783_v1  }
 0x1b2   : > { %1389 = vset.pattern.permute.xlu1 %v1597_v44 }
 0x21c   : > { %v564_v45 = vpop.permute.xlu1 %563 }
 0x21d   : > { %v566_v46 = vsub.f32 %v557_v41, %v564_v45 }
 0x21f   : > { %v567_v47 = vmax.f32 %v566_v46, 0.0 }
 0x221   : > { %v568_v48 = vadd.f32 1e-05, %v567_v47 }
 0x223   : > { %1419 = vrsqrt.f32 %v568_v48  ;;  %v573_v51 = vpop.permute.xlu0 %572 }
 0x224   : > { %v575_v52 = vsub.f32 %v1781_v0, %v573_v51 }
 0x229   : > { %v584_v50 = vpop.permute.xlu1 %583 }
 0x230   : > { %v1420_v49 = vpop.eup %1419 }
 0x231   : > { %578 = vperm.xlu1 %1389, %v1420_v49  }
 0x235   : > { %588 = vperm.xlu1 %1389, %v1783_v1  }
 0x239   : > { %1390 = vset.pattern.permute.xlu1 %v1598_v62 }
 0x2ac   : > { %v579_v53 = vpop.permute.xlu1 %578 }
 0x2ad   : > { %v581_v54 = vmul.f32 %v579_v53, %v575_v52 }
 0x2af   : > { %v586_v55 = vmul.f32 %v584_v50, %v581_v54 }
 0x2b0   : > { %v589_v56 = vpop.permute.xlu1 %588 }
 0x2b1   : > { %v591_v57 = vadd.f32 %v589_v56, %v586_v55 }
 0x2b3   : > { %v1191_v58 = vmul.f32 -1.442695, %v591_v57 }
 0x2b5   : > { %1421 = vpow2.f32 %v1191_v58 }
 0x2c2   : > { %v1422_v59 = vpop.eup %1421 }
 0x2c3   : > { %v595_v60 = vadd.f32 1.0, %v1422_v59 }
 0x2c5   : > { %1423 = vrcp.f32 %v595_v60 }
 0x2d2   : > { %v1424_v63 = vpop.eup %1423 }
 0x2d3   : > { %v598_v0 = vmul.f32 %v1424_v63, %v591_v57 }
 0x2d5   : > { %608 = vrot.lane.b32.xlu1 %v598_v0, %s1599_s13 }
 0x2d9   : > { %599 = vrot.lane.b32.xlu1 %v598_v0, %s1600_s15 }
 0x2dd   : > { %719 = vperm.xlu1 %1390, %v1827_v2  }
 0x2e1   : > { %715 = vperm.xlu1 %1390, %v1783_v1  }
 0x2e5   : > { %1391 = vset.pattern.permute.xlu1 %v1595_v36 }
 0x347   : > { %v609_v7 = vpop.permute.xlu1 %608 }
 0x348   : > { %1266 = vmatprep.subr.msk.mxu1 %vm612_vm4, %v609_v7 }
 0x349   : > { %1267 = vmatpush3.msk.msra.mxu1 %vm612_vm4, %v609_v7 }
 0x34a   : > { %1268 = vmatprep.subr.mxu1 %v598_v0 }
 0x34b   : > { %1269 = vmatpush3.msra.mxu1 %v598_v0  ;;  %v600_v8 = vpop.permute.xlu1 %599 }
 0x34c   : > { %1270 = vmatprep.subr.msk.mxu1 %vm602_vm5, %v600_v8 }
 0x34d   : > { %1271 = vmatpush3.msk.msra.mxu1 %vm602_vm5, %v600_v8 }
 0x34e   : > { %1273 = vmatmul.mubr.msk.f32.vlgmr.msra.gmra.mxu1 %vm381_vm0, %v325_v9 }
 0x358   : > { %v720_v10 = vpop.permute.xlu1 %719 }
 0x35c   : > { %v716_v15 = vpop.permute.xlu1 %715 }
 0x40e   : > { %v1274_v11 = vpop.f32.mrf.mxu1 }
 0x40f   : > { %v1840_v12 = vadd.f32 %v1274_v11, %v720_v10 }
 0x410   : > { %v695_v13 = vpop.f32.mrf.mxu1 }
 0x411   : > { %736 = vadd.xlane.f32.xlu1 %v1840_v12  ;;  %v739_v14 = vmul.f32 %v1840_v12, %v1840_v12  ;;  %v1845_v16 = vadd.f32 %v716_v15, %v695_v13 }
 0x413   : > { %742 = vadd.xlane.f32.xlu0 %v739_v14  ;;  %v738_v17 = vmul.f32 %v1845_v16, %v1845_v16 }
 0x415   : > { %734 = vadd.xlane.f32.xlu1 %v1845_v16 }
 0x419   : > { %740 = vadd.xlane.f32.xlu1 %v738_v17 }
 0x429   : > { %748 = vrot.lane.b32.xlu0 %v1827_v2, %s1601_s17 }
 0x42a   : > { %746 = vrot.lane.b32.xlu1 %v1783_v1, %s1601_s17 }
 0x42d   : > { %371 = vrot.lane.b32.xlu0 %v1827_v2, %s1602_s11 }
 0x431   : > { %375 = vrot.lane.b32.xlu0 %v319_v18, %s1602_s11 }
 0x49a   : > { %v737_v19 = vpop.xlane.xlu1 %736 }
 0x49c   : > { %v743_v20 = vpop.xlane.xlu0 %742 }
 0x49d   : > { %v745_v21 = vsel %vm484_vm2, %v737_v19, %v743_v20 }
 0x49e   : > { %v735_v22 = vpop.xlane.xlu1 %734  ;;  %1278 = vmatprep.subr.mxu0 %v745_v21 }
 0x49f   : > { %1279 = vmatpush3.msra.mxu0 %v745_v21 }
 0x4a0   : > { %v749_v26 = vpop.permute.xlu0 %748 }
 0x4a2   : > { %v741_v23 = vpop.xlane.xlu1 %740 }
 0x4a3   : > { %v744_v24 = vsel %vm484_vm2, %v735_v22, %v741_v23  ;;  %v326_v23 = vld [vmem:[%s1947_s3 + $0x10] sm:$0xff] }
 0x4a4   : > { %1280 = vmatprep.subr.mxu0 %v744_v24  ;;  %v372_v48 = vpop.permute.xlu0 %371  ;;  %1275 = vmatprep.mubr.msk.f32.mxu1 %vm381_vm0, %v326_v23 }
 0x4a5   : > { %1281 = vmatpush3.msra.mxu0 %v744_v24  ;;  %v466_v51 = vadd.f32 %v1810_v37, %v372_v48  ;;  %v327_v24 = vld [vmem:[%s1947_s3 + $0x18] sm:$0xff] }
 0x4a6   : > { %v747_v25 = vpop.permute.xlu1 %746  ;;  %1276 = vmatmul.mubr.msk.f32.gmra.mxu1 %vm381_vm0, %v327_v24 }
 0x4a7   : > { %1282 = vmatprep.mubr.msk.f32.mxu0 %vm750_vm6, %v747_v25  ;;  %v893_v53 = vadd.f32 1.0, %v466_v51 }
 0x4a8   : > { %1283 = vmatmul.mubr.msk.f32.vlgmr.msra.gmra.mxu0 %vm750_vm6, %v749_v26  ;;  %v376_v57 = vpop.permute.xlu0 %375 }
 0x4a9   : > { %v476_v37 = vadd.f32 %v1814_v39, %v376_v57 }
 0x568   : > { %v1284_v27 = vpop.f32.mrf.mxu0 }
 0x569   : > { %v831_v28 = vmul.f32 %v1284_v27, %v1284_v27  ;;  %855 = vperm.xlu0 %1387, %v1284_v27  }
 0x56a   : > { %v821_v29 = vpop.f32.mrf.mxu0 }
 0x56b   : > { %836 = vrot.lane.b32.xlu1 %v831_v28, %s1596_s10  ;;  %v830_v30 = vmul.f32 %v821_v29, %v821_v29  ;;  %v328_v28 = vld [vmem:[#allocation5] sm:$0xff] }
 0x56c   : > { %1297 = vmatprep.mubr.msk.f32.mxu1 %vm964_vm7, %v328_v28 }
 0x56d   : > { %1393 = vset.pattern.permute.xlu0 %v1603_v31 }
 0x56e   : > { %873 = vperm.xlu0 %1393, %v1783_v1  }
 0x56f   : > { %834 = vrot.lane.b32.xlu1 %v830_v30, %s1596_s10  ;;  %v1606_v30 = vmov 6  }
 0x572   : > { %1395 = vset.pattern.permute.xlu0 %v1597_v44 }
 0x573   : > { %369 = vrot.lane.b32.xlu1 %v1783_v1, %s1602_s11 }
 0x577   : > { %373 = vrot.lane.b32.xlu1 %v318_v32, %s1602_s11  ;;  %v948_v32 = vadd.s32 1, %v1832_v4  ;;  %s1521_s11 = sshll.u32 %s1608_s25, 4  ;;  %s1522_s11 = int_to_ptr.vmem [resolvable:$false] %s1521_s11 }
 0x578   : > { %s1523_s9 = scalar_lea.vmem %s1522_s11, 512 }
 0x579   : > { %vm950_vm8 = vcmp.lt.s32.totalorder %v948_v32, 128 }
 0x57b   : > { %850 = vperm.xlu1 %1391, %v821_v29  }
 0x57f   : > { %1392 = vset.pattern.permute.xlu1 %v1603_v31  ;;  %v1607_v31 = vmov 5  }
 0x580   : > { %877 = vperm.xlu1 %1392, %v1827_v2  }
 0x584   : > { %1394 = vset.pattern.permute.xlu1 %v1604_v33 }
 0x585   : > { %887 = vperm.xlu1 %1394, %v1827_v2  }
 0x589   : > { %883 = vperm.xlu1 %1394, %v1783_v1  }
 0x58d   : > { %1397 = vset.pattern.permute.xlu1 %v1597_v44 }
 0x5dd   : > { %v837_v34 = vpop.permute.xlu1 %836 }
 0x5de   : > { %v841_v35 = vsub.f32 %v1284_v27, %v837_v34 }
 0x5e0   : > { %v843_v41 = vmax.f32 %v841_v35, 0.0  ;;  %v936_v35 = vadd.s32 4294967295, %v1832_v4  ;;  %v1277_v4 = vpop.f32.mrf.mxu1 }
 0x5e1   : > { %v835_v42 = vpop.permute.xlu1 %834 }
 0x5e2   : > { %v845_v43 = vadd.f32 1e-05, %v843_v41  ;;  %v840_v45 = vsub.f32 %v821_v29, %v835_v42  ;;  %vm937_vm9 = vcmp.ge.s32.totalorder %v936_v35, 0 }
 0x5e4   : > { %1425 = vrsqrt.f32 %v845_v43  ;;  %v842_v46 = vmax.f32 %v840_v45, 0.0  ;;  %v856_v60 = vpop.permute.xlu0 %855  ;;  %v705_v45 = vpop.f32.mrf.mxu1 }
 0x5e5   : > { %v370_v49 = vpop.permute.xlu1 %369  ;;  %v859_v62 = vsub.f32 %v1840_v12, %v856_v60 }
 0x5e6   : > { %v844_v47 = vadd.f32 1e-05, %v842_v46  ;;  %v461_v44 = vadd.f32 %v1812_v38, %v370_v49 }
 0x5e8   : > { %1427 = vrsqrt.f32 %v844_v47  ;;  %v892_v55 = vadd.f32 1.0, %v461_v44 }
 0x5e9   : > { %v374_v54 = vpop.permute.xlu1 %373  ;;  %v874_v38 = vpop.permute.xlu0 %873 }
 0x5ea   : > { %v471_v56 = vadd.f32 %v1816_v40, %v374_v54 }
 0x5f1   : > { %v1426_v50 = vpop.eup %1425 }
 0x5f2   : > { %867 = vperm.xlu0 %1395, %v1426_v50  }
 0x5f5   : > { %v1428_v52 = vpop.eup %1427 }
 0x5f6   : > { %1396 = vset.pattern.permute.xlu0 %v1595_v36  ;;  %862 = vperm.xlu1 %1397, %v1428_v52   ;;  %v851_v58 = vpop.permute.xlu1 %850 }
 0x5f7   : > { %901 = vperm.xlu0 %1396, %v893_v53   ;;  %v858_v40 = vsub.f32 %v1845_v16, %v851_v58 }
 0x5fa   : > { %1398 = vset.pattern.permute.xlu1 %v1595_v36 }
 0x5fb   : > { %896 = vperm.xlu1 %1398, %v892_v55   ;;  %908 = vperm.xlu0 %1396, %v471_v56   ;;  %v878_v59 = vpop.permute.xlu1 %877 }
 0x5ff   : > { %913 = vperm.xlu1 %1398, %v476_v37   ;;  %1400 = vset.pattern.permute.xlu0 %v1606_v30 }
 0x600   : > { %v888_v61 = vpop.permute.xlu1 %887 }
 0x603   : > { %1399 = vset.pattern.permute.xlu1 %v1606_v30 }
 0x604   : > { %v884_v0 = vpop.permute.xlu1 %883 }
 0x66d   : > { %v868_v63 = vpop.permute.xlu0 %867 }
 0x66e   : > { %v871_v3 = vmul.f32 %v868_v63, %v859_v62 }
 0x670   : > { %v881_v5 = vmul.f32 %v878_v59, %v871_v3 }
 0x671   : > { %v863_v6 = vpop.permute.xlu1 %862 }
 0x672   : > { %v870_v36 = vmul.f32 %v863_v6, %v858_v40  ;;  %v902_v7 = vpop.permute.xlu0 %901  ;;  %v891_v9 = vadd.f32 %v888_v61, %v881_v5 }
 0x674   : > { %v880_v8 = vmul.f32 %v874_v38, %v870_v36  ;;  %v905_v13 = vmul.f32 %v902_v7, %v891_v9 }
 0x676   : > { %v890_v39 = vadd.f32 %v884_v0, %v880_v8  ;;  %v897_v10 = vpop.permute.xlu1 %896  ;;  %v909_v14 = vpop.permute.xlu0 %908 }
 0x678   : > { %v904_v11 = vmul.f32 %v897_v10, %v890_v39 }
 0x67a   : > { %v916_v15 = vadd.f32 %v909_v14, %v904_v11  ;;  %v914_v17 = vpop.permute.xlu1 %913 }
 0x67b   : > { %v917_v18 = vadd.f32 %v914_v17, %v905_v13 }
 0x67c   : > { %v1200_v12 = vmul.f32 -1.442695, %v916_v15 }
 0x67d   : > { %v1201_v19 = vmul.f32 -1.442695, %v917_v18 }
 0x67e   : > { %1429 = vpow2.f32 %v1200_v12 }
 0x67f   : > { %1431 = vpow2.f32 %v1201_v19 }
 0x68b   : > { %v1430_v20 = vpop.eup %1429 }
 0x68c   : > { %v1432_v16 = vpop.eup %1431  ;;  %v924_v21 = vadd.f32 1.0, %v1430_v20 }
 0x68d   : > { %v925_v22 = vadd.f32 1.0, %v1432_v16 }
 0x68e   : > { %1433 = vrcp.f32 %v924_v21 }
 0x68f   : > { %1435 = vrcp.f32 %v925_v22 }
 0x69b   : > { %v1434_v25 = vpop.eup %1433 }
 0x69c   : > { %v1436_v26 = vpop.eup %1435  ;;  %v930_v27 = vmul.f32 %v1434_v25, %v916_v15 }
 0x69d   : > { %v931_v29 = vmul.f32 %v1436_v26, %v917_v18 }
 0x69e   : > { %944 = vrot.lane.b32.xlu0 %v930_v27, %s1605_s20 }
 0x69f   : > { %946 = vrot.lane.b32.xlu1 %v931_v29, %s1605_s20 }
 0x6a2   : > { %932 = vrot.lane.b32.xlu0 %v930_v27, %s1596_s10 }
 0x6a3   : > { %934 = vrot.lane.b32.xlu1 %v931_v29, %s1596_s10  ;;  %s310_s10 = scalar_lea.vmem [#allocation8], %s1179_s26 }
 0x6a4   : > { %s1064_s4 = sshll.u32 %s310_s10, 4  ;;  %s1896_s4 = int_to_ptr.vmem [resolvable:$true] %s1064_s4 }
 0x6a5   : > { %s1517_s17 = scalar_lea.vmem %s1896_s4, 256  ;;  %p1524_p12 = scmp.lt.s32.totalorder %s1896_s4, %s1522_s11 }
 0x6a6   : > { %729 = vperm.xlu0 %1400, %v1827_v2   ;;  %p1518_p11 = scmp.ne.s32.totalorder %s1896_s4, %s1517_s17  ;;  %p1525_p7 = scmp.lt.s32.totalorder %s1523_s9, %s1517_s17 }
 0x6a7   : > { %725 = vperm.xlu1 %1399, %v1783_v1  }
 0x6a8   : > { %p1519_p2 = pnand %p1518_p11, %p1968_p1  ;;  %p1526_p9 = por %p1525_p7, %p1524_p12 }
 0x6aa   : > { %1402 = vset.pattern.permute.xlu0 %v1607_v31  ;;  %p1520_p6 = pneg %p1519_p2 }
 0x6ab   : > { %1401 = vset.pattern.permute.xlu1 %v1607_v31 }
 0x6ac   : > { %957 = vperm.xlu1 %1401, %v1783_v1   ;;  %p1527_p13 = pnand %p1526_p9, %p1520_p6 }
 0x6b0   : > { %961 = vperm.xlu1 %1401, %v1827_v2   ;;  %v329_v2 = vld [vmem:[#allocation5 + $0x8] sm:$0xff] }
 0x710   : > { %v945_v34 = vpop.permute.xlu0 %944 }
 0x711   : > { %v947_v33 = vpop.permute.xlu1 %946 }
 0x712   : > { %1285 = vmatprep.subr.msk.mxu1 %vm950_vm8, %v947_v33 }
 0x713   : > { %1286 = vmatpush3.msk.msra.mxu1 %vm950_vm8, %v947_v33 }
 0x714   : > { %1287 = vmatprep.subr.msk.mxu1 %vm950_vm8, %v945_v34  ;;  %v933_v1 = vpop.permute.xlu0 %932 }
 0x715   : > { %1288 = vmatpush3.msk.msra.mxu1 %vm950_vm8, %v945_v34  ;;  %v935_v41 = vpop.permute.xlu1 %934 }
 0x716   : > { %1289 = vmatprep.subr.mxu1 %v931_v29 }
 0x717   : > { %1290 = vmatpush3.msra.mxu1 %v931_v29 }
 0x718   : > { %1291 = vmatprep.subr.mxu1 %v930_v27 }
 0x719   : > { %1292 = vmatpush3.msra.mxu1 %v930_v27 }
 0x71a   : > { %1293 = vmatprep.subr.msk.mxu1 %vm937_vm9, %v935_v41 }
 0x71b   : > { %1294 = vmatpush3.msk.msra.mxu1 %vm937_vm9, %v935_v41 }
 0x71c   : > { %1295 = vmatprep.subr.msk.mxu1 %vm937_vm9, %v933_v1 }
 0x71d   : > { %1296 = vmatpush3.msk.msra.mxu1 %vm937_vm9, %v933_v1 }
 0x71e   : > { %1298 = vmatmul.mubr.msk.f32.vlgmr.msra.gmra.mxu1 %vm964_vm7, %v329_v2 }
 0x721   : > { %v730_v46 = vpop.permute.xlu0 %729 }
 0x722   : > { %v726_v42 = vpop.permute.xlu1 %725  ;;  %v733_v49 = vadd.f32 %v1277_v4, %v730_v46 }
 0x723   : > { %v732_v52 = vadd.f32 %v726_v42, %v705_v45 }
 0x727   : > { %v958_v43 = vpop.permute.xlu1 %957 }
 0x72b   : > { %v962_v48 = vpop.permute.xlu1 %961 }
 0x7de   : > { %v1299_v47 = vpop.f32.mrf.mxu1 }
 0x7df   : > { %v1043_v50 = vadd.f32 %v1299_v47, %v962_v48 }
 0x7e0   : > { %v1037_v51 = vpop.f32.mrf.mxu1 }
 0x7e1   : > { %v1038_v53 = vadd.f32 %v1037_v51, %v958_v43  ;;  %v1047_v44 = vadd.f32 %v1043_v50, %v733_v49 }
 0x7e3   : > { %v1046_v54 = vadd.f32 %v1038_v53, %v732_v52  ;;  %1049 = vst [vmem:[%s310_s10 + $0x8] sm:$0xff] %v1047_v44 }
 0x7e5   : > { %1048 = vst [vmem:[%s310_s10] sm:$0xff] %v1046_v54 }
 0x7e6   : > { %1530 = shalt.err (!%p1527_p13)
}
 0x7e7   : > { %s1531_s12 = scalar_lea.hbm %s1901_s16, 256  ;;  %s1535_s20 = scalar_lea.hbm %s1950_s6, 512 }
 0x7e8   : > { %p1532_p5 = scmp.ne.s32.totalorder %s1901_s16, %s1531_s12  ;;  %p1536_p4 = scmp.lt.s32.totalorder %s1901_s16, %s1950_s6 }
 0x7e9   : > { %p1537_p8 = scmp.lt.s32.totalorder %s1535_s20, %s1531_s12 }
 0x7ea   : > { %p1533_p10 = pnand %p1532_p5, %p1968_p1 }
 0x7eb   : > { %p1538_p3 = por %p1537_p8, %p1536_p4 }
 0x7ec   : > { %p1534_p0 = pneg %p1533_p10 }
 0x7ee   : > { %p1539_p11 = pnand %p1538_p3, %p1534_p0 }
 0x7f0   : > { %1542 = shalt.err (!%p1539_p11)
}
 0x7f1   : > { %s1609_s29 = smov 128   ;;  %s1610_s13 = smov 8  }
 0x7f2   : > { %1310 = dma.vmem_to_hbm [thread:$0]  (%p1968_p1), %s1896_s4, 256, %s1901_s16, %s1051_s27, %s1609_s29, %s1609_s29, %s1610_s13  }
 0x7f3 PF: > { %s1079_s15 = sand.u32 1, %s1573_s21   ;;  %p1969_p2 = scmp.ne.s32.totalorder %s1957_s28, 0 }
 0x7f4   : > { %p1970_p6 = scmp.ge.s32.totalorder %s1585_s24, 2  ;;  %s1080_s17 = scalar_lea.sflag [#allocation4], %s1079_s15 }
 0x7f6   : > { %p1324_p12 = pnand %p1970_p6, %p1969_p2 }
 0x7f8   : > { %p1325_p7 = pneg %p1324_p12 }
 0x7fa   : > { %1568 = dma.done.wait (%p1325_p7), %s1080_s17, 256  }
 0x7fb   : > { %1570 = vsyncadd (%p1325_p7), %s1080_s17, 4294967040  ;;  %p20_p9 = scmp.ge.s32.totalorder %s1718_s19, 4   ;;  %s1971_s21 = smov %s1577_s22 }
 0x7fc   : > { %s1972_s22 = smov %s1581_s23  ;;  %s1973_s23 = smov %s1734_s7 }
 0x7fd   : > { %s1974_s24 = smov %s1718_s19  ;;  %22 = sbr.rel (!%p20_p9) target bundleno = 8 (0x8), region = 100 }
 0x802   :  { %1085 = vsyncpa [#allocation3], 1 }
 0x803   :  { %1087 = vsyncpa [#allocation3 + $0x1], 1 }
 0x804   :  { %1088 = vsyncpa [#allocation6], 1 }
 0x805   :  { %1089 = vsyncpa [#allocation4], 1 }
 0x806   :  { %1091 = vsyncpa [#allocation4 + $0x1], 1 }

</bundles_post_ra>
